<compile_context>
chip_gen: v7x
topology: tpu7x:2x2x1
jax: 0.10.0
libtpu: 0.0.40
codegen_flags: <defaults>
</compile_context>

<pallas_src>
import math
from functools import partial

import jax
import jax.numpy as jnp
from jax import lax
from jax.experimental import pallas as pl


_LANE = 128
_SUBLANE = 8


# ----------------------------- helpers --------------------------------------

def _round_up(n, m):
    return ((n + m - 1) // m) * m


def _im2col_3x3(x_nchw):
    """im2col for a 3x3, stride-1, pad-1 conv.

    x_nchw: (N, C, H, W) -> (N*H*W, 9*C) with per-pixel column order (ki, kj, c).
    Runs as plain XLA glue and fuses under the surrounding jit.
    """
    N, C, H, W = x_nchw.shape
    x_nhwc = jnp.transpose(x_nchw, (0, 2, 3, 1))                 # (N, H, W, C)
    xp = jnp.pad(x_nhwc, ((0, 0), (1, 1), (1, 1), (0, 0)))
    cols = [xp[:, i:i + H, j:j + W, :] for i in range(3) for j in range(3)]
    patches = jnp.concatenate(cols, axis=-1)                     # (N, H, W, 9*C)
    return patches.reshape(N * H * W, 9 * C)


# ----------------------------- fused forward ---------------------------------

@partial(jax.jit, static_argnames=("feature_dim",))
def _supcon_forward(x_stacked, w_slab, b_slab, *, feature_dim):
    """x_stacked: (V, B, C, H, W) float input (V views concatenated on the M axis).

    Returns (V*B, feature_dim) L2-normalized embeddings.
    """
    V, B, C, H, W = x_stacked.shape
    hw = H * W
    VB = V * B
    M = VB * hw
    K = 9 * C
    R_pad = _round_up(max(VB, _SUBLANE), _SUBLANE)   # padded output rows (>= 8)
    inv_hw = 1.0 / float(hw)

    # im2col over all views at once + lane-dense K padding (fused under jit).
    x = x_stacked.reshape(VB, C, H, W).astype(jnp.float32)
    patches = _im2col_3x3(x)                                     # (M, K)
    patches = jnp.pad(patches, ((0, 0), (0, _LANE - K)))         # (M, 128)

    def kernel(p_ref, w_ref, b_ref, out_ref):
        inv_sqrt2 = 0.7071067811865476

        def gelu(v):  # exact erf GELU (matches nn.GELU() default)
            return 0.5 * v * (1.0 + lax.erf(v * inv_sqrt2))

        # Conv-as-matmul + bias + ReLU (all lane dims = 128, padded lanes zero).
        conv = jnp.dot(p_ref[...], w_ref[0],
                       preferred_element_type=jnp.float32) + b_ref[0:1, :]
        conv = jnp.maximum(conv, 0.0)                            # (M, 128)

        # Global average pool as an MXU matmul against an in-kernel generated
        # block-diagonal (R_pad, M) pooling matrix (no XLU reduce, no kron input).
        row_ids = lax.broadcasted_iota(jnp.int32, (R_pad, M), 0)
        col_ids = lax.broadcasted_iota(jnp.int32, (R_pad, M), 1)
        lower = row_ids * hw
        pool = jnp.where((col_ids >= lower) & (col_ids < lower + hw),
                         jnp.float32(inv_hw), jnp.float32(0.0))
        feat = jnp.dot(pool, conv, preferred_element_type=jnp.float32)  # (R_pad, 128)

        # Projection head: Linear -> GELU -> Linear -> GELU -> Linear.
        h = gelu(jnp.dot(feat, w_ref[1], preferred_element_type=jnp.float32)
                 + b_ref[1:2, :])
        h = gelu(jnp.dot(h, w_ref[2], preferred_element_type=jnp.float32)
                 + b_ref[2:3, :])
        z = jnp.dot(h, w_ref[3], preferred_element_type=jnp.float32) + b_ref[3:4, :]

        # F.normalize(z, dim=1): z / max(||z||, eps) == z * rsqrt(max(||z||^2, eps^2)).
        eps = 1e-12
        ss = jnp.sum(z * z, axis=1, keepdims=True)
        out_ref[...] = z * lax.rsqrt(jnp.maximum(ss, eps * eps))

    out = pl.pallas_call(
        kernel,
        out_shape=jax.ShapeDtypeStruct((R_pad, _LANE), jnp.float32),
    )(patches, w_slab, b_slab)

    # Padded rows/lanes carry exact zeros / garbage rows we never read: slice.
    return out[:VB, :feature_dim]


# ----------------------------- model wrapper ---------------------------------

class SupConResNetPallas:
    def __init__(self, key, in_channels=4, dim_in=32, feature_dim=128):
        assert 9 * in_channels <= _LANE, "conv patch dim must fit one 128-lane block"
        assert dim_in <= _LANE and feature_dim <= _LANE
        self.in_channels = in_channels
        self.dim_in = dim_in
        self.feature_dim = feature_dim

        ks = jax.random.split(key, 8)
        fan_c = in_channels * 9
        # Stand-in encoder conv: (Cout=dim_in, Cin, 3, 3).
        self.wc = (jax.random.normal(ks[0], (dim_in, in_channels, 3, 3),
                                     jnp.float32) / math.sqrt(fan_c))
        self.bc = jax.random.normal(ks[1], (dim_in,), jnp.float32) * 0.01
        # Projection head: Linear(d,d), Linear(d,d), Linear(d,feature_dim).
        self.w1 = jax.random.normal(ks[2], (dim_in, dim_in), jnp.float32) / math.sqrt(dim_in)
        self.b1 = jax.random.normal(ks[3], (dim_in,), jnp.float32) * 0.01
        self.w2 = jax.random.normal(ks[4], (dim_in, dim_in), jnp.float32) / math.sqrt(dim_in)
        self.b2 = jax.random.normal(ks[5], (dim_in,), jnp.float32) * 0.01
        self.w3 = jax.random.normal(ks[6], (dim_in, feature_dim), jnp.float32) / math.sqrt(dim_in)
        self.b3 = jax.random.normal(ks[7], (feature_dim,), jnp.float32) * 0.01

        # ---- consolidated, lane-dense weight/bias slabs (padded lanes = 0) ----
        K = 9 * in_channels
        # Conv weight as (9*C, dim_in) matching the (ki, kj, c) patch column order.
        wc_mat = jnp.transpose(self.wc, (2, 3, 1, 0)).reshape(K, dim_in)

        w_slab = jnp.zeros((4, _LANE, _LANE), jnp.float32)
        w_slab = w_slab.at[0, :K, :dim_in].set(wc_mat)
        w_slab = w_slab.at[1, :dim_in, :dim_in].set(self.w1)
        w_slab = w_slab.at[2, :dim_in, :dim_in].set(self.w2)
        w_slab = w_slab.at[3, :dim_in, :feature_dim].set(self.w3)
        self.w_slab = w_slab

        b_slab = jnp.zeros((_SUBLANE, _LANE), jnp.float32)
        b_slab = b_slab.at[0, :dim_in].set(self.bc)
        b_slab = b_slab.at[1, :dim_in].set(self.b1)
        b_slab = b_slab.at[2, :dim_in].set(self.b2)
        b_slab = b_slab.at[3, :feature_dim].set(self.b3)
        self.b_slab = b_slab

    def __call__(self, x):
        # Matches SupConResNet.forward: list of two views or a single tensor.
        if isinstance(x, (list, tuple)) and len(x) == 2:
            B = x[0].shape[0]
            xs = jnp.stack([x[0], x[1]], axis=0)            # (2, B, C, H, W)
            out = _supcon_forward(xs, self.w_slab, self.b_slab,
                                  feature_dim=self.feature_dim)  # (2B, F)
            return [out[:B], out[B:]]
        out = _supcon_forward(x[None], self.w_slab, self.b_slab,
                              feature_dim=self.feature_dim)
        return out


# ----------------------------- reference (pure JAX) ---------------------------

def _reference(model, x_nchw):
    conv = lax.conv_general_dilated(
        x_nchw.astype(jnp.float32), model.wc, window_strides=(1, 1),
        padding="SAME", dimension_numbers=("NCHW", "OIHW", "NCHW"))
    conv = jnp.maximum(conv + model.bc.reshape(1, -1, 1, 1), 0.0)
    feat = conv.mean(axis=(2, 3))                               # (B, dim_in)

    def gelu(v):
        return 0.5 * v * (1.0 + lax.erf(v / jnp.sqrt(2.0)))

    h = gelu(feat @ model.w1 + model.b1)
    h = gelu(h @ model.w2 + model.b2)
    z = h @ model.w3 + model.b3
    n = jnp.sqrt(jnp.sum(z * z, axis=1, keepdims=True))
    return z / jnp.maximum(n, 1e-12)


# ----------------------------- main ------------------------------------------

if __name__ == "__main__":
    key = jax.random.PRNGKey(0)
    k_param, k_x1, k_x2 = jax.random.split(key, 3)

    B, C, H, W = 2, 4, 16, 16
    x1 = jax.random.normal(k_x1, (B, C, H, W), jnp.float32)
    x2 = jax.random.normal(k_x2, (B, C, H, W), jnp.float32)

    model = SupConResNetPallas(k_param, in_channels=C, dim_in=32, feature_dim=128)

    # Single-view path (V=1, one fused pallas_call, one jit dispatch).
    out = jax.block_until_ready(model(x1))
    ref = _reference(model, x1)
    assert out.shape == (B, 128), out.shape
    assert jnp.allclose(out, ref, atol=2e-3, rtol=2e-3), "single-view mismatch"

    # Two-view contrastive path (V=2 collapsed into the M dimension, one launch).
    out2 = model([x1, x2])
    out2 = [jax.block_until_ready(o) for o in out2]
    ref1, ref2 = _reference(model, x1), _reference(model, x2)
    assert isinstance(out2, list) and len(out2) == 2
    assert out2[0].shape == (B, 128) and out2[1].shape == (B, 128)
    assert jnp.allclose(out2[0], ref1, atol=2e-3, rtol=2e-3), "view-1 mismatch"
    assert jnp.allclose(out2[1], ref2, atol=2e-3, rtol=2e-3), "view-2 mismatch"

    print("KERNEL_OK")
</pallas_src>

<mosaic_0001>
module attributes {stable_mosaic.version = 11 : i64} {
  func.func @kernel(%arg0: memref<512x128xf32, #tpu.memory_space<vmem>>, %arg1: memref<4x128x128xf32, #tpu.memory_space<vmem>>, %arg2: memref<8x128xf32, #tpu.memory_space<vmem>>, %arg3: memref<8x128xf32, #tpu.memory_space<vmem>>) attributes {dimension_semantics = [], scalar_prefetch = 0 : i64, scratch_operands = 0 : i64, tpu.core_type = #tpu.core_type<tc>} {
    %c0 = arith.constant 0 : index
    %c0_0 = arith.constant 0 : index
    %0 = vector.load %arg0[%c0, %c0_0] : memref<512x128xf32, #tpu.memory_space<vmem>>, vector<512x128xf32>
    %c0_1 = arith.constant 0 : index
    %c0_2 = arith.constant 0 : index
    %c0_3 = arith.constant 0 : index
    %1 = vector.load %arg1[%c0_1, %c0_2, %c0_3] : memref<4x128x128xf32, #tpu.memory_space<vmem>>, vector<1x128x128xf32>
    %2 = vector.shape_cast %1 : vector<1x128x128xf32> to vector<128x128xf32>
    %cst = arith.constant dense<0.000000e+00> : vector<512x128xf32>
    %3 = tpu.matmul %0, %2, %cst {dimension_numbers = #tpu.dot_dimension_numbers<[1], [0], [0], [1], [0, 0, 1, 1], [], []>} : vector<512x128xf32>, vector<128x128xf32>, vector<512x128xf32> -> vector<512x128xf32>
    %c0_4 = arith.constant 0 : index
    %c0_5 = arith.constant 0 : index
    %4 = vector.load %arg2[%c0_4, %c0_5] : memref<8x128xf32, #tpu.memory_space<vmem>>, vector<1x128xf32>
    %5 = vector.broadcast %4 : vector<1x128xf32> to vector<512x128xf32>
    %6 = arith.addf %3, %5 : vector<512x128xf32>
    %cst_6 = arith.constant 0.000000e+00 : f32
    %7 = vector.broadcast %cst_6 : f32 to vector<512x128xf32>
    %8 = arith.maximumf %6, %7 : vector<512x128xf32>
    %9 = tpu.iota {dimensions = array<i32: 0>} : vector<8x512xi32>
    %10 = tpu.iota {dimensions = array<i32: 1>} : vector<8x512xi32>
    %c256_i32 = arith.constant 256 : i32
    %11 = vector.broadcast %c256_i32 : i32 to vector<8x512xi32>
    %12 = arith.muli %9, %11 : vector<8x512xi32>
    %13 = arith.cmpi sge, %10, %12 : vector<8x512xi32>
    %c256_i32_7 = arith.constant 256 : i32
    %14 = vector.broadcast %c256_i32_7 : i32 to vector<8x512xi32>
    %15 = arith.addi %12, %14 : vector<8x512xi32>
    %16 = arith.cmpi slt, %10, %15 : vector<8x512xi32>
    %17 = arith.andi %13, %16 : vector<8x512xi1>
    %cst_8 = arith.constant 3.906250e-03 : f32
    %cst_9 = arith.constant 0.000000e+00 : f32
    %18 = vector.broadcast %cst_8 : f32 to vector<8x512xf32>
    %19 = vector.broadcast %cst_9 : f32 to vector<8x512xf32>
    %20 = arith.select %17, %18, %19 : vector<8x512xi1>, vector<8x512xf32>
    %cst_10 = arith.constant dense<0.000000e+00> : vector<8x128xf32>
    %21 = tpu.matmul %20, %8, %cst_10 {dimension_numbers = #tpu.dot_dimension_numbers<[1], [0], [0], [1], [0, 0, 1, 1], [], []>} : vector<8x512xf32>, vector<512x128xf32>, vector<8x128xf32> -> vector<8x128xf32>
    %c1 = arith.constant 1 : index
    %c0_11 = arith.constant 0 : index
    %c0_12 = arith.constant 0 : index
    %22 = vector.load %arg1[%c1, %c0_11, %c0_12] : memref<4x128x128xf32, #tpu.memory_space<vmem>>, vector<1x128x128xf32>
    %23 = vector.shape_cast %22 : vector<1x128x128xf32> to vector<128x128xf32>
    %cst_13 = arith.constant dense<0.000000e+00> : vector<8x128xf32>
    %24 = tpu.matmul %21, %23, %cst_13 {dimension_numbers = #tpu.dot_dimension_numbers<[1], [0], [0], [1], [0, 0, 1, 1], [], []>} : vector<8x128xf32>, vector<128x128xf32>, vector<8x128xf32> -> vector<8x128xf32>
    %c1_14 = arith.constant 1 : index
    %c0_15 = arith.constant 0 : index
    %25 = vector.load %arg2[%c1_14, %c0_15] : memref<8x128xf32, #tpu.memory_space<vmem>>, vector<1x128xf32>
    %26 = vector.broadcast %25 : vector<1x128xf32> to vector<8x128xf32>
    %27 = arith.addf %24, %26 : vector<8x128xf32>
    %cst_16 = arith.constant 5.000000e-01 : f32
    %28 = vector.broadcast %cst_16 : f32 to vector<8x128xf32>
    %29 = arith.mulf %28, %27 : vector<8x128xf32>
    %cst_17 = arith.constant 0.707106769 : f32
    %30 = vector.broadcast %cst_17 : f32 to vector<8x128xf32>
    %31 = arith.mulf %27, %30 : vector<8x128xf32>
    %32 = math.erf %31 : vector<8x128xf32>
    %cst_18 = arith.constant 1.000000e+00 : f32
    %33 = vector.broadcast %cst_18 : f32 to vector<8x128xf32>
    %34 = arith.addf %33, %32 : vector<8x128xf32>
    %35 = arith.mulf %29, %34 : vector<8x128xf32>
    %c2 = arith.constant 2 : index
    %c0_19 = arith.constant 0 : index
    %c0_20 = arith.constant 0 : index
    %36 = vector.load %arg1[%c2, %c0_19, %c0_20] : memref<4x128x128xf32, #tpu.memory_space<vmem>>, vector<1x128x128xf32>
    %37 = vector.shape_cast %36 : vector<1x128x128xf32> to vector<128x128xf32>
    %cst_21 = arith.constant dense<0.000000e+00> : vector<8x128xf32>
    %38 = tpu.matmul %35, %37, %cst_21 {dimension_numbers = #tpu.dot_dimension_numbers<[1], [0], [0], [1], [0, 0, 1, 1], [], []>} : vector<8x128xf32>, vector<128x128xf32>, vector<8x128xf32> -> vector<8x128xf32>
    %c2_22 = arith.constant 2 : index
    %c0_23 = arith.constant 0 : index
    %39 = vector.load %arg2[%c2_22, %c0_23] : memref<8x128xf32, #tpu.memory_space<vmem>>, vector<1x128xf32>
    %40 = vector.broadcast %39 : vector<1x128xf32> to vector<8x128xf32>
    %41 = arith.addf %38, %40 : vector<8x128xf32>
    %cst_24 = arith.constant 5.000000e-01 : f32
    %42 = vector.broadcast %cst_24 : f32 to vector<8x128xf32>
    %43 = arith.mulf %42, %41 : vector<8x128xf32>
    %cst_25 = arith.constant 0.707106769 : f32
    %44 = vector.broadcast %cst_25 : f32 to vector<8x128xf32>
    %45 = arith.mulf %41, %44 : vector<8x128xf32>
    %46 = math.erf %45 : vector<8x128xf32>
    %cst_26 = arith.constant 1.000000e+00 : f32
    %47 = vector.broadcast %cst_26 : f32 to vector<8x128xf32>
    %48 = arith.addf %47, %46 : vector<8x128xf32>
    %49 = arith.mulf %43, %48 : vector<8x128xf32>
    %c3 = arith.constant 3 : index
    %c0_27 = arith.constant 0 : index
    %c0_28 = arith.constant 0 : index
    %50 = vector.load %arg1[%c3, %c0_27, %c0_28] : memref<4x128x128xf32, #tpu.memory_space<vmem>>, vector<1x128x128xf32>
    %51 = vector.shape_cast %50 : vector<1x128x128xf32> to vector<128x128xf32>
    %cst_29 = arith.constant dense<0.000000e+00> : vector<8x128xf32>
    %52 = tpu.matmul %49, %51, %cst_29 {dimension_numbers = #tpu.dot_dimension_numbers<[1], [0], [0], [1], [0, 0, 1, 1], [], []>} : vector<8x128xf32>, vector<128x128xf32>, vector<8x128xf32> -> vector<8x128xf32>
    %c3_30 = arith.constant 3 : index
    %c0_31 = arith.constant 0 : index
    %53 = vector.load %arg2[%c3_30, %c0_31] : memref<8x128xf32, #tpu.memory_space<vmem>>, vector<1x128xf32>
    %54 = vector.broadcast %53 : vector<1x128xf32> to vector<8x128xf32>
    %55 = arith.addf %52, %54 : vector<8x128xf32>
    %56 = arith.mulf %55, %55 : vector<8x128xf32>
    %cst_32 = arith.constant dense<0.000000e+00> : vector<8xf32>
    %57 = vector.multi_reduction <add>, %56, %cst_32 [1] : vector<8x128xf32> to vector<8xf32>
    %58 = vector.shape_cast %57 : vector<8xf32> to vector<8x1xf32>
    %cst_33 = arith.constant 1.000000e-24 : f32
    %59 = vector.broadcast %cst_33 : f32 to vector<8x1xf32>
    %60 = arith.maximumf %58, %59 : vector<8x1xf32>
    %61 = math.rsqrt %60 : vector<8x1xf32>
    %62 = vector.broadcast %61 : vector<8x1xf32> to vector<8x128xf32>
    %63 = arith.mulf %55, %62 : vector<8x128xf32>
    %c0_34 = arith.constant 0 : index
    %c0_35 = arith.constant 0 : index
    %64 = vector.load %arg3[%c0_34, %c0_35] : memref<8x128xf32, #tpu.memory_space<vmem>>, vector<8x128xf32>
    tpu.vector_store %arg3[%c0_34, %c0_35], %63 {strides = array<i32>} : memref<8x128xf32, #tpu.memory_space<vmem>>, vector<8x128xf32>,
    return
  }
}

</mosaic_0001>

<bundles_post_ra>
// kernel: _supcon_forward.1
= control target key start
LH: loop header
LB: loop body
LE: loop exit
PB: predicated region body
PF: predicated region fallthrough
CT: control target
= control target key end

     0   :  { %vm1680_vm12 = vmmov 0   ;;  %s2264_s1 = inlined_call_operand.vmem [shape: f32[4,128,128], index: 1, kind: input, shape index: {}]   ;;  %s2265_s0 = inlined_call_operand.vmem [shape: f32[512,128], index: 0, kind: input, shape index: {}]   ;;  %s2266_s2 = inlined_call_operand.vmem [shape: f32[8,128], index: 2, kind: input, shape index: {}]   ;;  %s2267_s3 = inlined_call_operand.vmem [shape: f32[8,128], index: 3, kind: output, shape index: {}]  }
   0x1   :  { %v78_v0 = vld [vmem:[%s2264_s1] sm:$0xff]  ;;  %v79_v1 = vld [vmem:[%s2264_s1 + $0x8] sm:$0xff]  ;;  %v80_v2 = vld [vmem:[%s2264_s1 + $0x10] sm:$0xff] }
   0x2   :  { %v1500_v3 = vpack.c.bf16 %v79_v1, %v78_v0  ;;  %v81_v4 = vld [vmem:[%s2264_s1 + $0x18] sm:$0xff]  ;;  %v82_v6 = vld [vmem:[%s2264_s1 + $0x20] sm:$0xff]  ;;  %v83_v7 = vld [vmem:[%s2264_s1 + $0x28] sm:$0xff] }
   0x3   :  { %v1504_v5 = vpack.c.bf16 %v81_v4, %v80_v2  ;;  %v1508_v8 = vpack.c.bf16 %v83_v7, %v82_v6  ;;  %v14_v9 = vld [vmem:[%s2265_s0] sm:$0xff]  ;;  %v84_v10 = vld [vmem:[%s2264_s1 + $0x30] sm:$0xff]  ;;  %v85_v11 = vld [vmem:[%s2264_s1 + $0x38] sm:$0xff] }
   0x4   :  { %1501 = vmatprep.subr.bf16.mxu0 %v1500_v3  ;;  %1299 = vmatprep.mubr.f32.mxu0 %v14_v9  ;;  %v1512_v12 = vpack.c.bf16 %v85_v11, %v84_v10  ;;  %v86_v13 = vld [vmem:[%s2264_s1 + $0x40] sm:$0xff]  ;;  %v87_v14 = vld [vmem:[%s2264_s1 + $0x48] sm:$0xff]  ;;  %v88_v16 = vld [vmem:[%s2264_s1 + $0x50] sm:$0xff] }
   0x5   :  { %1503 = vmatpush3.bf16.msra.mxu0 %v1500_v3  ;;  %v1516_v15 = vpack.c.bf16 %v87_v14, %v86_v13  ;;  %v89_v17 = vld [vmem:[%s2264_s1 + $0x58] sm:$0xff]  ;;  %v90_v19 = vld [vmem:[%s2264_s1 + $0x60] sm:$0xff]  ;;  %v91_v20 = vld [vmem:[%s2264_s1 + $0x68] sm:$0xff] }
   0x6   :  { %1505 = vmatprep.subr.bf16.mxu0 %v1504_v5  ;;  %v1520_v18 = vpack.c.bf16 %v89_v17, %v88_v16  ;;  %v1524_v21 = vpack.c.bf16 %v91_v20, %v90_v19  ;;  %v92_v22 = vld [vmem:[%s2264_s1 + $0x70] sm:$0xff]  ;;  %v93_v23 = vld [vmem:[%s2264_s1 + $0x78] sm:$0xff]  ;;  %v15_v25 = vld [vmem:[%s2265_s0 + $0x8] sm:$0xff] }
   0x7   :  { %v1528_v24 = vpack.c.bf16 %v93_v23, %v92_v22  ;;  %v16_v26 = vld [vmem:[%s2265_s0 + $0x10] sm:$0xff]  ;;  %v17_v27 = vld [vmem:[%s2265_s0 + $0x18] sm:$0xff]  ;;  %v18_v28 = vld [vmem:[%s2265_s0 + $0x20] sm:$0xff] }
   0x8   :  { %v19_v29 = vld [vmem:[%s2265_s0 + $0x28] sm:$0xff]  ;;  %v20_v30 = vld [vmem:[%s2265_s0 + $0x30] sm:$0xff]  ;;  %v21_v31 = vld [vmem:[%s2265_s0 + $0x38] sm:$0xff] }
   0x9   :  { %1507 = vmatpush3.bf16.msra.mxu0 %v1504_v5  ;;  %v22_v32 = vld [vmem:[%s2265_s0 + $0x40] sm:$0xff]  ;;  %v23_v33 = vld [vmem:[%s2265_s0 + $0x48] sm:$0xff]  ;;  %v24_v34 = vld [vmem:[%s2265_s0 + $0x50] sm:$0xff] }
   0xa   :  { %1509 = vmatprep.subr.bf16.mxu0 %v1508_v8  ;;  %v25_v35 = vld [vmem:[%s2265_s0 + $0x58] sm:$0xff]  ;;  %v26_v36 = vld [vmem:[%s2265_s0 + $0x60] sm:$0xff]  ;;  %v27_v37 = vld [vmem:[%s2265_s0 + $0x68] sm:$0xff] }
   0xb   :  { %v28_v38 = vld [vmem:[%s2265_s0 + $0x70] sm:$0xff]  ;;  %v29_v39 = vld [vmem:[%s2265_s0 + $0x78] sm:$0xff]  ;;  %v30_v40 = vld [vmem:[%s2265_s0 + $0x80] sm:$0xff] }
   0xc   :  { %v31_v41 = vld [vmem:[%s2265_s0 + $0x88] sm:$0xff]  ;;  %v32_v42 = vld [vmem:[%s2265_s0 + $0x90] sm:$0xff]  ;;  %v33_v43 = vld [vmem:[%s2265_s0 + $0x98] sm:$0xff] }
   0xd   :  { %1511 = vmatpush3.bf16.msra.mxu0 %v1508_v8  ;;  %v34_v44 = vld [vmem:[%s2265_s0 + $0xa0] sm:$0xff]  ;;  %v35_v45 = vld [vmem:[%s2265_s0 + $0xa8] sm:$0xff]  ;;  %v36_v46 = vld [vmem:[%s2265_s0 + $0xb0] sm:$0xff] }
   0xe   :  { %1513 = vmatprep.subr.bf16.mxu0 %v1512_v12  ;;  %v37_v47 = vld [vmem:[%s2265_s0 + $0xb8] sm:$0xff]  ;;  %v38_v48 = vld [vmem:[%s2265_s0 + $0xc0] sm:$0xff]  ;;  %v39_v49 = vld [vmem:[%s2265_s0 + $0xc8] sm:$0xff] }
   0xf   :  { %v40_v50 = vld [vmem:[%s2265_s0 + $0xd0] sm:$0xff]  ;;  %v41_v51 = vld [vmem:[%s2265_s0 + $0xd8] sm:$0xff]  ;;  %v42_v52 = vld [vmem:[%s2265_s0 + $0xe0] sm:$0xff] }
  0x10   :  { %v43_v53 = vld [vmem:[%s2265_s0 + $0xe8] sm:$0xff]  ;;  %v44_v54 = vld [vmem:[%s2265_s0 + $0xf0] sm:$0xff]  ;;  %v45_v55 = vld [vmem:[%s2265_s0 + $0xf8] sm:$0xff] }
  0x11   :  { %1515 = vmatpush3.bf16.msra.mxu0 %v1512_v12  ;;  %v46_v56 = vld [vmem:[%s2265_s0 + $0x100] sm:$0xff]  ;;  %v47_v57 = vld [vmem:[%s2265_s0 + $0x108] sm:$0xff]  ;;  %v48_v58 = vld [vmem:[%s2265_s0 + $0x110] sm:$0xff] }
  0x12   :  { %1517 = vmatprep.subr.bf16.mxu0 %v1516_v15  ;;  %v49_v59 = vld [vmem:[%s2265_s0 + $0x118] sm:$0xff]  ;;  %v50_v60 = vld [vmem:[%s2265_s0 + $0x120] sm:$0xff]  ;;  %v51_v61 = vld [vmem:[%s2265_s0 + $0x128] sm:$0xff] }
  0x13   :  { %v52_v62 = vld [vmem:[%s2265_s0 + $0x130] sm:$0xff]  ;;  %v53_v63 = vld [vmem:[%s2265_s0 + $0x138] sm:$0xff]  ;;  %v54_v0 = vld [vmem:[%s2265_s0 + $0x140] sm:$0xff] }
  0x14   :  { %v55_v1 = vld [vmem:[%s2265_s0 + $0x148] sm:$0xff]  ;;  %v56_v2 = vld [vmem:[%s2265_s0 + $0x150] sm:$0xff]  ;;  %v57_v3 = vld [vmem:[%s2265_s0 + $0x158] sm:$0xff] }
  0x15   :  { %1519 = vmatpush3.bf16.msra.mxu0 %v1516_v15  ;;  %v58_v4 = vld [vmem:[%s2265_s0 + $0x160] sm:$0xff]  ;;  %v59_v5 = vld [vmem:[%s2265_s0 + $0x168] sm:$0xff]  ;;  %v60_v6 = vld [vmem:[%s2265_s0 + $0x170] sm:$0xff] }
  0x16   :  { %1521 = vmatprep.subr.bf16.mxu0 %v1520_v18  ;;  %v61_v7 = vld [vmem:[%s2265_s0 + $0x178] sm:$0xff]  ;;  %v62_v8 = vld [vmem:[%s2265_s0 + $0x180] sm:$0xff]  ;;  %v63_v9 = vld [vmem:[%s2265_s0 + $0x188] sm:$0xff] }
  0x17   :  { %v64_v10 = vld [vmem:[%s2265_s0 + $0x190] sm:$0xff]  ;;  %v65_v11 = vld [vmem:[%s2265_s0 + $0x198] sm:$0xff]  ;;  %v66_v12 = vld [vmem:[%s2265_s0 + $0x1a0] sm:$0xff] }
  0x18   :  { %v67_v13 = vld [vmem:[%s2265_s0 + $0x1a8] sm:$0xff]  ;;  %v68_v14 = vld [vmem:[%s2265_s0 + $0x1b0] sm:$0xff]  ;;  %v69_v15 = vld [vmem:[%s2265_s0 + $0x1b8] sm:$0xff] }
  0x19   :  { %1523 = vmatpush3.bf16.msra.mxu0 %v1520_v18  ;;  %v70_v16 = vld [vmem:[%s2265_s0 + $0x1c0] sm:$0xff]  ;;  %v71_v17 = vld [vmem:[%s2265_s0 + $0x1c8] sm:$0xff]  ;;  %v72_v18 = vld [vmem:[%s2265_s0 + $0x1d0] sm:$0xff] }
  0x1a   :  { %1525 = vmatprep.subr.bf16.mxu0 %v1524_v21  ;;  %v73_v19 = vld [vmem:[%s2265_s0 + $0x1d8] sm:$0xff]  ;;  %v74_v20 = vld [vmem:[%s2265_s0 + $0x1e0] sm:$0xff]  ;;  %v76_v22 = vld [vmem:[%s2265_s0 + $0x1f0] sm:$0xff] }
  0x1b   :  { %v77_v23 = vld [vmem:[%s2265_s0 + $0x1f8] sm:$0xff] }
  0x1d   :  { %1527 = vmatpush3.bf16.msra.mxu0 %v1524_v21  ;;  %v75_v21 = vld [vmem:[%s2265_s0 + $0x1e8] sm:$0xff] }
  0x1e   :  { %1529 = vmatprep.subr.bf16.mxu0 %v1528_v24 }
  0x21   :  { %1531 = vmatpush3.bf16.msra.mxu0 %v1528_v24  ;;  %v548_v24 = vlaneseq }
  0x24   :  { %1300 = vmatmul.mubr.f32.vlgmr.msra.gmra.mrb[0].mxu0 %v15_v25  ;;  %v549_v25 = vshrl.u32 %v548_v24, 7 }
  0x25   :  { %1302 = vmatprep.mubr.f32.mxu0 %v16_v26  ;;  %v551_v26 = vand.u32 127, %v548_v24 }
  0x28   :  { %1303 = vmatmul.mubr.f32.gmra.mrb[2].mxu0 %v17_v27  ;;  %v555_v27 = vmul.u32 256, %v549_v25 }
  0x29   :  { %1305 = vmatprep.mubr.f32.mxu0 %v18_v28  ;;  %v552_v28 = vadd.s32 128, %v551_v26 }
  0x2a   :  { %vm556_vm3 = vcmp.ge.s32.totalorder %v551_v26, %v555_v27 }
  0x2b   :  { %vm557_vm0 = vcmp.ge.s32.totalorder %v552_v28, %v555_v27 }
  0x2c   :  { %1306 = vmatmul.mubr.f32.gmra.mrb[4].mxu0 %v19_v29  ;;  %v560_v29 = vadd.s32 256, %v555_v27 }
  0x2d   :  { %1308 = vmatprep.mubr.f32.mxu0 %v20_v30  ;;  %v1678_v30 = vmov 0.00390625  }
  0x2e   :  { %vm562_vm1 = vcmp.lt.s32.totalorder %v552_v28, %v560_v29  ;;  %vm561_vm4 = vcmp.lt.s32.totalorder %v551_v26, %v560_v29 }
  0x2f   :  { %vm566_vm2 = vmand %vm557_vm0, %vm562_vm1 }
  0x30   :  { %1309 = vmatmul.mubr.f32.gmra.mrb[6].mxu0 %v21_v31  ;;  %1011 = vmatprep.mubr.msk.f32.mxu1 %vm566_vm2, %v1678_v30  ;;  %vm1943_vm5 = vmand %vm556_vm3, %vm561_vm4 }
  0x31   :  { %1311 = vmatprep.mubr.f32.mxu0 %v22_v32  ;;  %v1950_v32 = vld [vmem:[%s2266_s2] ss:$0 sm:$0xff] }
  0x34   :  { %1312 = vmatmul.mubr.f32.gmra.mrb[8].mxu0 %v23_v33 }
  0x35   :  { %1314 = vmatprep.mubr.f32.mxu0 %v24_v34 }
  0x38   :  { %1315 = vmatmul.mubr.f32.gmra.mrb[10].mxu0 %v25_v35 }
  0x39   :  { %1317 = vmatprep.mubr.f32.mxu0 %v26_v36 }
  0x3c   :  { %1318 = vmatmul.mubr.f32.gmra.mrb[12].mxu0 %v27_v37 }
  0x3d   :  { %1320 = vmatprep.mubr.f32.mxu0 %v28_v38  ;;  %v554_v38 = vadd.s32 384, %v551_v26 }
  0x3f   :  { %vm559_vm6 = vcmp.ge.s32.totalorder %v554_v38, %v555_v27  ;;  %vm564_vm7 = vcmp.lt.s32.totalorder %v554_v38, %v560_v29 }
  0x40   :  { %1321 = vmatmul.mubr.f32.gmra.mrb[14].mxu0 %v29_v39  ;;  %vm1958_vm8 = vmand %vm559_vm6, %vm564_vm7 }
  0x41   :  { %1323 = vmatprep.mubr.f32.mxu0 %v30_v40 }
  0x44   :  { %1324 = vmatmul.mubr.f32.gmra.mrb[16].mxu0 %v31_v41  ;;  %v553_v41 = vadd.s32 256, %v551_v26 }
  0x45   :  { %1326 = vmatprep.mubr.f32.mxu0 %v32_v42 }
  0x46   :  { %vm558_vm9 = vcmp.ge.s32.totalorder %v553_v41, %v555_v27  ;;  %vm563_vm10 = vcmp.lt.s32.totalorder %v553_v41, %v560_v29 }
  0x47   :  { %vm1962_vm11 = vmand %vm558_vm9, %vm563_vm10 }
  0x48   :  { %1327 = vmatmul.mubr.f32.gmra.mrb[18].mxu0 %v33_v43 }
  0x49   :  { %1329 = vmatprep.mubr.f32.mxu0 %v34_v44 }
  0x4c   :  { %1330 = vmatmul.mubr.f32.gmra.mrb[20].mxu0 %v35_v45 }
  0x4d   :  { %1332 = vmatprep.mubr.f32.mxu0 %v36_v46 }
  0x50   :  { %1333 = vmatmul.mubr.f32.gmra.mrb[22].mxu0 %v37_v47 }
  0x51   :  { %1335 = vmatprep.mubr.f32.mxu0 %v38_v48 }
  0x54   :  { %1336 = vmatmul.mubr.f32.gmra.mrb[24].mxu0 %v39_v49 }
  0x55   :  { %1338 = vmatprep.mubr.f32.mxu0 %v40_v50 }
  0x58   :  { %1339 = vmatmul.mubr.f32.gmra.mrb[26].mxu0 %v41_v51 }
  0x59   :  { %1341 = vmatprep.mubr.f32.mxu0 %v42_v52 }
  0x5c   :  { %1342 = vmatmul.mubr.f32.gmra.mrb[28].mxu0 %v43_v53 }
  0x5d   :  { %1344 = vmatprep.mubr.f32.mxu0 %v44_v54 }
  0x60   :  { %1345 = vmatmul.mubr.f32.gmra.mrb[30].mxu0 %v45_v55 }
  0x61   :  { %1347 = vmatprep.mubr.f32.mxu0 %v46_v56 }
  0x64   :  { %1348 = vmatmul.mubr.f32.gmra.mrb[32].mxu0 %v47_v57 }
  0x65   :  { %1350 = vmatprep.mubr.f32.mxu0 %v48_v58 }
  0x68   :  { %1351 = vmatmul.mubr.f32.gmra.mrb[34].mxu0 %v49_v59 }
  0x69   :  { %1353 = vmatprep.mubr.f32.mxu0 %v50_v60 }
  0x6c   :  { %1354 = vmatmul.mubr.f32.gmra.mrb[36].mxu0 %v51_v61 }
  0x6d   :  { %1356 = vmatprep.mubr.f32.mxu0 %v52_v62 }
  0x70   :  { %1357 = vmatmul.mubr.f32.gmra.mrb[38].mxu0 %v53_v63 }
  0x71   :  { %1359 = vmatprep.mubr.f32.mxu0 %v54_v0 }
  0x74   :  { %1360 = vmatmul.mubr.f32.gmra.mrb[40].mxu0 %v55_v1 }
  0x75   :  { %1362 = vmatprep.mubr.f32.mxu0 %v56_v2 }
  0x78   :  { %1363 = vmatmul.mubr.f32.gmra.mrb[42].mxu0 %v57_v3 }
  0x79   :  { %1365 = vmatprep.mubr.f32.mxu0 %v58_v4 }
  0x7c   :  { %1366 = vmatmul.mubr.f32.gmra.mrb[44].mxu0 %v59_v5 }
  0x7d   :  { %1368 = vmatprep.mubr.f32.mxu0 %v60_v6 }
  0x80   :  { %1369 = vmatmul.mubr.f32.gmra.mrb[46].mxu0 %v61_v7 }
  0x81   :  { %1371 = vmatprep.mubr.f32.mxu0 %v62_v8 }
  0x84   :  { %1372 = vmatmul.mubr.f32.gmra.mrb[48].mxu0 %v63_v9 }
  0x85   :  { %1374 = vmatprep.mubr.f32.mxu0 %v64_v10 }
  0x88   :  { %1375 = vmatmul.mubr.f32.gmra.mrb[50].mxu0 %v65_v11 }
  0x89   :  { %1377 = vmatprep.mubr.f32.mxu0 %v66_v12 }
  0x8c   :  { %1378 = vmatmul.mubr.f32.gmra.mrb[52].mxu0 %v67_v13 }
  0x8d   :  { %1380 = vmatprep.mubr.f32.mxu0 %v68_v14 }
  0x90   :  { %1381 = vmatmul.mubr.f32.gmra.mrb[54].mxu0 %v69_v15 }
  0x91   :  { %1383 = vmatprep.mubr.f32.mxu0 %v70_v16 }
  0x94   :  { %1384 = vmatmul.mubr.f32.gmra.mrb[56].mxu0 %v71_v17 }
  0x95   :  { %1386 = vmatprep.mubr.f32.mxu0 %v72_v18 }
  0x98   :  { %1387 = vmatmul.mubr.f32.gmra.mrb[58].mxu0 %v73_v19 }
  0x99   :  { %1389 = vmatprep.mubr.f32.mxu0 %v74_v20 }
  0x9c   :  { %1390 = vmatmul.mubr.f32.gmra.mrb[60].mxu0 %v75_v21 }
  0x9d   :  { %1392 = vmatprep.mubr.f32.mxu0 %v76_v22 }
  0xa0   :  { %1393 = vmatmul.mubr.f32.gmra.mrb[62].mxu0 %v77_v23 }
  0xf7   :  { %v1301_v33 = vpop.f32.mrb[0].mxu0 }
  0xf8   :  { %v171_v34 = vadd.f32 %v1301_v33, %v1950_v32  ;;  %v165_v35 = vpop.f32.mrb[1].mxu0 }
  0xf9   :  { %v166_v36 = vadd.f32 %v1950_v32, %v165_v35 }
  0xfa   :  { %v485_v37 = vmax.f32 %v171_v34, 0.0 }
  0xfb   :  { %v484_v39 = vmax.f32 %v166_v36, 0.0  ;;  %v1304_v40 = vpop.f32.mrb[2].mxu0 }
  0xfc   :  { %v181_v42 = vadd.f32 %v1304_v40, %v1950_v32  ;;  %v175_v43 = vpop.f32.mrb[3].mxu0 }
  0xfd   :  { %v176_v44 = vadd.f32 %v1950_v32, %v175_v43  ;;  %v1956_v45 = vpack.c.bf16 %v485_v37, %v484_v39 }
  0xfe   :  { %v487_v47 = vmax.f32 %v181_v42, 0.0 }
  0xff   :  { %v486_v49 = vmax.f32 %v176_v44, 0.0  ;;  %v1307_v50 = vpop.f32.mrb[4].mxu0 }
 0x100   :  { %v191_v51 = vadd.f32 %v1307_v50, %v1950_v32  ;;  %v185_v52 = vpop.f32.mrb[5].mxu0 }
 0x101   :  { %v1967_v53 = vpack.c.bf16 %v487_v47, %v486_v49  ;;  %v186_v54 = vadd.f32 %v1950_v32, %v185_v52 }
 0x102   :  { %v489_v55 = vmax.f32 %v191_v51, 0.0 }
 0x103   :  { %v488_v56 = vmax.f32 %v186_v54, 0.0  ;;  %v1310_v57 = vpop.f32.mrb[6].mxu0 }
 0x104   :  { %v201_v58 = vadd.f32 %v1310_v57, %v1950_v32  ;;  %v195_v59 = vpop.f32.mrb[7].mxu0 }
 0x105   :  { %v1971_v60 = vpack.c.bf16 %v489_v55, %v488_v56  ;;  %v196_v61 = vadd.f32 %v1950_v32, %v195_v59 }
 0x106   :  { %v491_v62 = vmax.f32 %v201_v58, 0.0 }
 0x107   :  { %v490_v63 = vmax.f32 %v196_v61, 0.0  ;;  %v1313_v0 = vpop.f32.mrb[8].mxu0 }
 0x108   :  { %v211_v1 = vadd.f32 %v1313_v0, %v1950_v32  ;;  %v205_v2 = vpop.f32.mrb[9].mxu0 }
 0x109   :  { %v1975_v3 = vpack.c.bf16 %v491_v62, %v490_v63  ;;  %v206_v4 = vadd.f32 %v1950_v32, %v205_v2 }
 0x10a   :  { %v493_v5 = vmax.f32 %v211_v1, 0.0 }
 0x10b   :  { %v492_v6 = vmax.f32 %v206_v4, 0.0  ;;  %v1316_v7 = vpop.f32.mrb[10].mxu0 }
 0x10c   :  { %v221_v8 = vadd.f32 %v1316_v7, %v1950_v32  ;;  %v215_v9 = vpop.f32.mrb[11].mxu0 }
 0x10d   :  { %v1979_v10 = vpack.c.bf16 %v493_v5, %v492_v6  ;;  %v216_v11 = vadd.f32 %v1950_v32, %v215_v9 }
 0x10e   :  { %v495_v12 = vmax.f32 %v221_v8, 0.0 }
 0x10f   :  { %v494_v13 = vmax.f32 %v216_v11, 0.0  ;;  %v1319_v14 = vpop.f32.mrb[12].mxu0 }
 0x110   :  { %v231_v15 = vadd.f32 %v1319_v14, %v1950_v32  ;;  %v225_v16 = vpop.f32.mrb[13].mxu0 }
 0x111   :  { %v1983_v17 = vpack.c.bf16 %v495_v12, %v494_v13  ;;  %v226_v18 = vadd.f32 %v1950_v32, %v225_v16 }
 0x112   :  { %v497_v19 = vmax.f32 %v231_v15, 0.0 }
 0x113   :  { %v496_v20 = vmax.f32 %v226_v18, 0.0  ;;  %v1322_v21 = vpop.f32.mrb[14].mxu0 }
 0x114   :  { %v241_v22 = vadd.f32 %v1322_v21, %v1950_v32  ;;  %v235_v23 = vpop.f32.mrb[15].mxu0 }
 0x115   :  { %v1987_v24 = vpack.c.bf16 %v497_v19, %v496_v20  ;;  %v236_v25 = vadd.f32 %v1950_v32, %v235_v23 }
 0x116   :  { %v499_v26 = vmax.f32 %v241_v22, 0.0 }
 0x117   :  { %v498_v27 = vmax.f32 %v236_v25, 0.0  ;;  %v1325_v28 = vpop.f32.mrb[16].mxu0 }
 0x118   :  { %v251_v29 = vadd.f32 %v1325_v28, %v1950_v32  ;;  %v245_v33 = vpop.f32.mrb[17].mxu0 }
 0x119   :  { %v1991_v34 = vpack.c.bf16 %v499_v26, %v498_v27  ;;  %v246_v35 = vadd.f32 %v1950_v32, %v245_v33 }
 0x11a   :  { %v501_v36 = vmax.f32 %v251_v29, 0.0 }
 0x11b   :  { %v500_v37 = vmax.f32 %v246_v35, 0.0  ;;  %v1328_v38 = vpop.f32.mrb[18].mxu0 }
 0x11c   :  { %v261_v39 = vadd.f32 %v1328_v38, %v1950_v32  ;;  %v255_v40 = vpop.f32.mrb[19].mxu0 }
 0x11d   :  { %v256_v41 = vadd.f32 %v1950_v32, %v255_v40  ;;  %v1532_v42 = vpack.c.bf16 %v501_v36, %v500_v37 }
 0x11e   :  { %v503_v43 = vmax.f32 %v261_v39, 0.0 }
 0x11f   :  { %v502_v44 = vmax.f32 %v256_v41, 0.0  ;;  %v1331_v47 = vpop.f32.mrb[20].mxu0  ;;  %1533 = vmatprep.subr.bf16.mxu1 %v1532_v42 }
 0x120   :  { %v271_v49 = vadd.f32 %v1331_v47, %v1950_v32  ;;  %v265_v50 = vpop.f32.mrb[21].mxu0  ;;  %1535 = vmatpush3.bf16.msra.mxu1 %v1956_v45 }
 0x121   :  { %v1536_v51 = vpack.c.bf16 %v503_v43, %v502_v44  ;;  %v266_v52 = vadd.f32 %v1950_v32, %v265_v50 }
 0x122   :  { %v505_v54 = vmax.f32 %v271_v49, 0.0 }
 0x123   :  { %v504_v55 = vmax.f32 %v266_v52, 0.0  ;;  %v1334_v56 = vpop.f32.mrb[22].mxu0  ;;  %1537 = vmatprep.subr.bf16.mxu1 %v1536_v51 }
 0x124   :  { %v281_v57 = vadd.f32 %v1334_v56, %v1950_v32  ;;  %v275_v58 = vpop.f32.mrb[23].mxu0  ;;  %1539 = vmatpush3.bf16.msra.mxu1 %v1967_v53 }
 0x125   :  { %v1540_v59 = vpack.c.bf16 %v505_v54, %v504_v55  ;;  %v276_v61 = vadd.f32 %v1950_v32, %v275_v58 }
 0x126   :  { %v507_v62 = vmax.f32 %v281_v57, 0.0 }
 0x127   :  { %v506_v63 = vmax.f32 %v276_v61, 0.0  ;;  %v1337_v0 = vpop.f32.mrb[24].mxu0  ;;  %1541 = vmatprep.subr.bf16.mxu1 %v1540_v59 }
 0x128   :  { %v291_v45 = vadd.f32 %v1337_v0, %v1950_v32  ;;  %v285_v1 = vpop.f32.mrb[25].mxu0  ;;  %1543 = vmatpush3.bf16.msra.mxu1 %v1971_v60 }
 0x129   :  { %v1544_v2 = vpack.c.bf16 %v507_v62, %v506_v63  ;;  %v286_v4 = vadd.f32 %v1950_v32, %v285_v1 }
 0x12a   :  { %v509_v5 = vmax.f32 %v291_v45, 0.0 }
 0x12b   :  { %v508_v6 = vmax.f32 %v286_v4, 0.0  ;;  %v1340_v7 = vpop.f32.mrb[26].mxu0  ;;  %1545 = vmatprep.subr.bf16.mxu1 %v1544_v2 }
 0x12c   :  { %v301_v53 = vadd.f32 %v1340_v7, %v1950_v32  ;;  %v295_v8 = vpop.f32.mrb[27].mxu0  ;;  %1547 = vmatpush3.bf16.msra.mxu1 %v1975_v3 }
 0x12d   :  { %v1548_v9 = vpack.c.bf16 %v509_v5, %v508_v6  ;;  %v296_v11 = vadd.f32 %v1950_v32, %v295_v8 }
 0x12e   :  { %v511_v12 = vmax.f32 %v301_v53, 0.0 }
 0x12f   :  { %v510_v13 = vmax.f32 %v296_v11, 0.0  ;;  %v1343_v14 = vpop.f32.mrb[28].mxu0  ;;  %1549 = vmatprep.subr.bf16.mxu1 %v1548_v9 }
 0x130   :  { %v311_v60 = vadd.f32 %v1343_v14, %v1950_v32  ;;  %v305_v15 = vpop.f32.mrb[29].mxu0  ;;  %1551 = vmatpush3.bf16.msra.mxu1 %v1979_v10 }
 0x131   :  { %v1552_v16 = vpack.c.bf16 %v511_v12, %v510_v13  ;;  %v306_v18 = vadd.f32 %v1950_v32, %v305_v15 }
 0x132   :  { %v513_v19 = vmax.f32 %v311_v60, 0.0 }
 0x133   :  { %v512_v20 = vmax.f32 %v306_v18, 0.0  ;;  %v1346_v21 = vpop.f32.mrb[30].mxu0  ;;  %1553 = vmatprep.subr.bf16.mxu1 %v1552_v16 }
 0x134   :  { %v321_v3 = vadd.f32 %v1346_v21, %v1950_v32  ;;  %v315_v22 = vpop.f32.mrb[31].mxu0  ;;  %1555 = vmatpush3.bf16.msra.mxu1 %v1983_v17 }
 0x135   :  { %v1556_v23 = vpack.c.bf16 %v513_v19, %v512_v20  ;;  %v316_v25 = vadd.f32 %v1950_v32, %v315_v22 }
 0x136   :  { %v515_v26 = vmax.f32 %v321_v3, 0.0 }
 0x137   :  { %v514_v27 = vmax.f32 %v316_v25, 0.0  ;;  %v1349_v28 = vpop.f32.mrb[32].mxu0  ;;  %1557 = vmatprep.subr.bf16.mxu1 %v1556_v23 }
 0x138   :  { %v331_v10 = vadd.f32 %v1349_v28, %v1950_v32  ;;  %v325_v29 = vpop.f32.mrb[33].mxu0  ;;  %1559 = vmatpush3.bf16.msra.mxu1 %v1987_v24 }
 0x139   :  { %v1560_v33 = vpack.c.bf16 %v515_v26, %v514_v27  ;;  %v326_v35 = vadd.f32 %v1950_v32, %v325_v29 }
 0x13a   :  { %v517_v36 = vmax.f32 %v331_v10, 0.0 }
 0x13b   :  { %v516_v37 = vmax.f32 %v326_v35, 0.0  ;;  %v1352_v38 = vpop.f32.mrb[34].mxu0  ;;  %1561 = vmatprep.subr.bf16.mxu1 %v1560_v33 }
 0x13c   :  { %v341_v17 = vadd.f32 %v1352_v38, %v1950_v32  ;;  %v335_v39 = vpop.f32.mrb[35].mxu0  ;;  %1563 = vmatpush3.bf16.msra.mxu1 %v1991_v34 }
 0x13d   :  { %v2019_v40 = vpack.c.bf16 %v517_v36, %v516_v37  ;;  %v336_v41 = vadd.f32 %v1950_v32, %v335_v39 }
 0x13e   :  { %v519_v42 = vmax.f32 %v341_v17, 0.0 }
 0x13f   :  { %v518_v43 = vmax.f32 %v336_v41, 0.0  ;;  %v1355_v44 = vpop.f32.mrb[36].mxu0  ;;  %1012 = vmatmul.mubr.msk.f32.vlgmr.msra.gmra.mrb[0].mxu1 %vm1943_vm5, %v1678_v30 }
 0x140   :  { %v351_v24 = vadd.f32 %v1355_v44, %v1950_v32  ;;  %v345_v47 = vpop.f32.mrb[37].mxu0  ;;  %1013 = vmatprep.mubr.msk.f32.mxu1 %vm1958_vm8, %v1678_v30 }
 0x141   :  { %v2029_v49 = vpack.c.bf16 %v519_v42, %v518_v43  ;;  %v346_v34 = vadd.f32 %v1950_v32, %v345_v47 }
 0x142   :  { %v521_v50 = vmax.f32 %v351_v24, 0.0 }
 0x143   :  { %v520_v51 = vmax.f32 %v346_v34, 0.0  ;;  %v1358_v52 = vpop.f32.mrb[38].mxu0 }
 0x144   :  { %v361_v54 = vadd.f32 %v1358_v52, %v1950_v32  ;;  %v355_v55 = vpop.f32.mrb[39].mxu0 }
 0x145   :  { %v2033_v56 = vpack.c.bf16 %v521_v50, %v520_v51  ;;  %v356_v31 = vadd.f32 %v1950_v32, %v355_v55 }
 0x146   :  { %v523_v57 = vmax.f32 %v361_v54, 0.0 }
 0x147   :  { %v522_v58 = vmax.f32 %v356_v31, 0.0  ;;  %v1361_v59 = vpop.f32.mrb[40].mxu0 }
 0x148   :  { %v371_v46 = vadd.f32 %v1361_v59, %v1950_v32  ;;  %v365_v61 = vpop.f32.mrb[41].mxu0 }
 0x149   :  { %v2037_v62 = vpack.c.bf16 %v523_v57, %v522_v58  ;;  %v366_v63 = vadd.f32 %v1950_v32, %v365_v61 }
 0x14a   :  { %v525_v0 = vmax.f32 %v371_v46, 0.0 }
 0x14b   :  { %v524_v45 = vmax.f32 %v366_v63, 0.0  ;;  %v1364_v1 = vpop.f32.mrb[42].mxu0 }
 0x14c   :  { %v381_v2 = vadd.f32 %v1364_v1, %v1950_v32  ;;  %v375_v4 = vpop.f32.mrb[43].mxu0 }
 0x14d   :  { %v2041_v5 = vpack.c.bf16 %v525_v0, %v524_v45  ;;  %v376_v6 = vadd.f32 %v1950_v32, %v375_v4 }
 0x14e   :  { %v527_v7 = vmax.f32 %v381_v2, 0.0 }
 0x14f   :  { %v526_v53 = vmax.f32 %v376_v6, 0.0  ;;  %v1367_v8 = vpop.f32.mrb[44].mxu0 }
 0x150   :  { %v391_v9 = vadd.f32 %v1367_v8, %v1950_v32  ;;  %v385_v11 = vpop.f32.mrb[45].mxu0 }
 0x151   :  { %v2045_v12 = vpack.c.bf16 %v527_v7, %v526_v53  ;;  %v386_v13 = vadd.f32 %v1950_v32, %v385_v11 }
 0x152   :  { %v529_v14 = vmax.f32 %v391_v9, 0.0 }
 0x153   :  { %v528_v60 = vmax.f32 %v386_v13, 0.0  ;;  %v1370_v15 = vpop.f32.mrb[46].mxu0 }
 0x154   :  { %v401_v16 = vadd.f32 %v1370_v15, %v1950_v32  ;;  %v395_v18 = vpop.f32.mrb[47].mxu0 }
 0x155   :  { %v2049_v19 = vpack.c.bf16 %v529_v14, %v528_v60  ;;  %v396_v20 = vadd.f32 %v1950_v32, %v395_v18 }
 0x156   :  { %v531_v21 = vmax.f32 %v401_v16, 0.0 }
 0x157   :  { %v530_v3 = vmax.f32 %v396_v20, 0.0  ;;  %v1373_v22 = vpop.f32.mrb[48].mxu0 }
 0x158   :  { %v411_v23 = vadd.f32 %v1373_v22, %v1950_v32  ;;  %v405_v25 = vpop.f32.mrb[49].mxu0  ;;  %v1019_v22 = vld [vmem:[%s2264_s1 + $0xa0] sm:$0xff] }
 0x159   :  { %v2053_v26 = vpack.c.bf16 %v531_v21, %v530_v3  ;;  %v406_v27 = vadd.f32 %v1950_v32, %v405_v25  ;;  %v1679_v21 = vmov 0.0|0.0  }
 0x15a   :  { %v533_v28 = vmax.f32 %v411_v23, 0.0  ;;  %1644 = vmatprep.subr.bf16.mxu0 %v1679_v21  ;;  %v1020_v23 = vld [vmem:[%s2264_s1 + $0xa8] sm:$0xff] }
 0x15b   :  { %v532_v10 = vmax.f32 %v406_v27, 0.0  ;;  %v1376_v29 = vpop.f32.mrb[50].mxu0  ;;  %v1603_v25 = vpack.c.bf16 %v1020_v23, %v1019_v22  ;;  %v1022_v27 = vld [vmem:[%s2264_s1 + $0xb8] sm:$0xff]  ;;  %v1058_v22 = vld [vmem:[%s2264_s1 + $0x1c8] sm:$0xff] }
 0x15c   :  { %v421_v33 = vadd.f32 %v1376_v29, %v1950_v32  ;;  %v415_v35 = vpop.f32.mrb[51].mxu0  ;;  %v1024_v29 = vld [vmem:[%s2264_s1 + $0xc8] sm:$0xff] }
 0x15d   :  { %v1564_v36 = vpack.c.bf16 %v533_v28, %v532_v10  ;;  %v416_v37 = vadd.f32 %v1950_v32, %v415_v35  ;;  %v1023_v10 = vld [vmem:[%s2264_s1 + $0xc0] sm:$0xff]  ;;  %v1025_v35 = vld [vmem:[%s2264_s1 + $0xd0] sm:$0xff] }
 0x15e   :  { %v535_v38 = vmax.f32 %v421_v33, 0.0  ;;  %v1609_v33 = vpack.c.bf16 %v1024_v29, %v1023_v10  ;;  %v1062_v10 = vld [vmem:[%s2264_s1 + $0x1e8] sm:$0xff] }
 0x15f   :  { %v534_v17 = vmax.f32 %v416_v37, 0.0  ;;  %v1379_v39 = vpop.f32.mrb[52].mxu0  ;;  %1565 = vmatprep.subr.bf16.mxu1 %v1564_v36  ;;  %v1026_v36 = vld [vmem:[%s2264_s1 + $0xd8] sm:$0xff] }
 0x160   :  { %v431_v41 = vadd.f32 %v1379_v39, %v1950_v32  ;;  %v425_v42 = vpop.f32.mrb[53].mxu0  ;;  %1567 = vmatpush3.bf16.msra.mxu1 %v2019_v40  ;;  %v1612_v37 = vpack.c.bf16 %v1026_v36, %v1025_v35 }
 0x161   :  { %v1568_v43 = vpack.c.bf16 %v535_v38, %v534_v17  ;;  %v426_v44 = vadd.f32 %v1950_v32, %v425_v42  ;;  %v1027_v38 = vld [vmem:[%s2264_s1 + $0xe0] sm:$0xff]  ;;  %v1028_v17 = vld [vmem:[%s2264_s1 + $0xe8] sm:$0xff]  ;;  %v1030_v42 = vld [vmem:[%s2264_s1 + $0xf8] sm:$0xff] }
 0x162   :  { %v537_v24 = vmax.f32 %v431_v41, 0.0  ;;  %v1615_v39 = vpack.c.bf16 %v1028_v17, %v1027_v38  ;;  %v1029_v41 = vld [vmem:[%s2264_s1 + $0xf0] sm:$0xff] }
 0x163   :  { %v536_v47 = vmax.f32 %v426_v44, 0.0  ;;  %v1382_v34 = vpop.f32.mrb[54].mxu0  ;;  %1569 = vmatprep.subr.bf16.mxu1 %v1568_v43  ;;  %v1618_v43 = vpack.c.bf16 %v1030_v42, %v1029_v41  ;;  %v1681_v44 = vmov 0.0  }
 0x164   :  { %v441_v50 = vadd.f32 %v1382_v34, %v1950_v32  ;;  %v435_v51 = vpop.f32.mrb[55].mxu0  ;;  %1571 = vmatpush3.bf16.msra.mxu1 %v2029_v49  ;;  %1497 = vmatprep.mubr.msk.f32.mxu0 %vm1680_vm12, %v1681_v44 }
 0x165   :  { %v1572_v52 = vpack.c.bf16 %v537_v24, %v536_v47  ;;  %v436_v54 = vadd.f32 %v1950_v32, %v435_v51  ;;  %v1032_v51 = vld [vmem:[%s2264_s1 + $0x100] sm:$0xff] }
 0x166   :  { %v539_v55 = vmax.f32 %v441_v50, 0.0 }
 0x167   :  { %v538_v31 = vmax.f32 %v436_v54, 0.0  ;;  %v1385_v57 = vpop.f32.mrb[56].mxu0  ;;  %1573 = vmatprep.subr.bf16.mxu1 %v1572_v52  ;;  %v1033_v52 = vld [vmem:[%s2264_s1 + $0x108] sm:$0xff] }
 0x168   :  { %v451_v40 = vadd.f32 %v1385_v57, %v1950_v32  ;;  %v445_v58 = vpop.f32.mrb[57].mxu0  ;;  %1575 = vmatpush3.bf16.msra.mxu1 %v2033_v56 }
 0x169   :  { %v1576_v59 = vpack.c.bf16 %v539_v55, %v538_v31  ;;  %v446_v46 = vadd.f32 %v1950_v32, %v445_v58  ;;  %v1621_v31 = vpack.c.bf16 %v1033_v52, %v1032_v51  ;;  %v1035_v58 = vld [vmem:[%s2264_s1 + $0x118] sm:$0xff] }
 0x16a   :  { %v541_v61 = vmax.f32 %v451_v40, 0.0  ;;  %v1034_v40 = vld [vmem:[%s2264_s1 + $0x110] sm:$0xff] }
 0x16b   :  { %v540_v63 = vmax.f32 %v446_v46, 0.0  ;;  %v1388_v0 = vpop.f32.mrb[58].mxu0  ;;  %1577 = vmatprep.subr.bf16.mxu1 %v1576_v59  ;;  %v1624_v59 = vpack.c.bf16 %v1035_v58, %v1034_v40  ;;  %v1036_v46 = vld [vmem:[%s2264_s1 + $0x120] sm:$0xff] }
 0x16c   :  { %v461_v49 = vadd.f32 %v1388_v0, %v1950_v32  ;;  %v455_v45 = vpop.f32.mrb[59].mxu0  ;;  %1579 = vmatpush3.bf16.msra.mxu1 %v2037_v62  ;;  %v1038_v0 = vld [vmem:[%s2264_s1 + $0x130] sm:$0xff] }
 0x16d   :  { %v1580_v1 = vpack.c.bf16 %v541_v61, %v540_v63  ;;  %v456_v2 = vadd.f32 %v1950_v32, %v455_v45  ;;  %v1037_v61 = vld [vmem:[%s2264_s1 + $0x128] sm:$0xff] }
 0x16e   :  { %v543_v4 = vmax.f32 %v461_v49, 0.0  ;;  %v1627_v63 = vpack.c.bf16 %v1037_v61, %v1036_v46  ;;  %v1039_v49 = vld [vmem:[%s2264_s1 + $0x138] sm:$0xff] }
 0x16f   :  { %v542_v6 = vmax.f32 %v456_v2, 0.0  ;;  %v1391_v7 = vpop.f32.mrb[60].mxu0  ;;  %1581 = vmatprep.subr.bf16.mxu1 %v1580_v1  ;;  %v1630_v45 = vpack.c.bf16 %v1039_v49, %v1038_v0  ;;  %v1040_v1 = vld [vmem:[%s2264_s1 + $0x140] sm:$0xff]  ;;  %v1041_v2 = vld [vmem:[%s2264_s1 + $0x148] sm:$0xff] }
 0x170   :  { %v471_v56 = vadd.f32 %v1391_v7, %v1950_v32  ;;  %v465_v53 = vpop.f32.mrb[61].mxu0  ;;  %1583 = vmatpush3.bf16.msra.mxu1 %v2041_v5  ;;  %v1043_v7 = vld [vmem:[%s2264_s1 + $0x158] sm:$0xff] }
 0x171   :  { %v1584_v8 = vpack.c.bf16 %v543_v4, %v542_v6  ;;  %v466_v9 = vadd.f32 %v1950_v32, %v465_v53  ;;  %v1633_v4 = vpack.c.bf16 %v1041_v2, %v1040_v1  ;;  %v1042_v6 = vld [vmem:[%s2264_s1 + $0x150] sm:$0xff]  ;;  %v1044_v53 = vld [vmem:[%s2264_s1 + $0x160] sm:$0xff] }
 0x172   :  { %v545_v11 = vmax.f32 %v471_v56, 0.0  ;;  %v1636_v56 = vpack.c.bf16 %v1043_v7, %v1042_v6 }
 0x173   :  { %v544_v13 = vmax.f32 %v466_v9, 0.0  ;;  %v1394_v14 = vpop.f32.mrb[62].mxu0  ;;  %1585 = vmatprep.subr.bf16.mxu1 %v1584_v8  ;;  %v1045_v8 = vld [vmem:[%s2264_s1 + $0x168] sm:$0xff] }
 0x174   :  { %v481_v62 = vadd.f32 %v1394_v14, %v1950_v32  ;;  %v475_v60 = vpop.f32.mrb[63].mxu0  ;;  %1587 = vmatpush3.bf16.msra.mxu1 %v2045_v12  ;;  %v1015_v12 = vld [vmem:[%s2264_s1 + $0x80] sm:$0xff]  ;;  %v1639_v9 = vpack.c.bf16 %v1045_v8, %v1044_v53 }
 0x175   :  { %v1588_v15 = vpack.c.bf16 %v545_v11, %v544_v13  ;;  %v476_v16 = vadd.f32 %v1950_v32, %v475_v60  ;;  %v1016_v32 = vld [vmem:[%s2264_s1 + $0x88] sm:$0xff]  ;;  %v1046_v11 = vld [vmem:[%s2264_s1 + $0x170] sm:$0xff]  ;;  %v1047_v13 = vld [vmem:[%s2264_s1 + $0x178] sm:$0xff] }
 0x176   :  { %v547_v18 = vmax.f32 %v481_v62, 0.0  ;;  %v1597_v3 = vpack.c.bf16 %v1016_v32, %v1015_v12  ;;  %v1642_v14 = vpack.c.bf16 %v1047_v13, %v1046_v11  ;;  %v1049_v62 = vld [vmem:[%s2264_s1 + $0x180] sm:$0xff]  ;;  %v1050_v60 = vld [vmem:[%s2264_s1 + $0x188] sm:$0xff] }
 0x177   :  { %v546_v20 = vmax.f32 %v476_v16, 0.0  ;;  %1589 = vmatprep.subr.bf16.mxu1 %v1588_v15  ;;  %v1051_v15 = vld [vmem:[%s2264_s1 + $0x190] sm:$0xff]  ;;  %v1645_v16 = vpack.c.bf16 %v1050_v60, %v1049_v62  ;;  %v1054_v12 = vld [vmem:[%s2264_s1 + $0x1a8] sm:$0xff] }
 0x178   :  { %1591 = vmatpush3.bf16.msra.mxu1 %v2049_v19  ;;  %v1017_v19 = vld [vmem:[%s2264_s1 + $0x90] sm:$0xff] }
 0x179   :  { %v1592_v5 = vpack.c.bf16 %v547_v18, %v546_v20  ;;  %v1052_v18 = vld [vmem:[%s2264_s1 + $0x198] sm:$0xff]  ;;  %1646 = vmatpush3.bf16.msra.mxu0 %v1645_v16 }
 0x17a   :  { %v1648_v20 = vpack.c.bf16 %v1052_v18, %v1051_v15  ;;  %1647 = vmatprep.subr.bf16.mxu0 %v1679_v21 }
 0x17b   :  { %1593 = vmatprep.subr.bf16.mxu1 %v1592_v5  ;;  %v1053_v5 = vld [vmem:[%s2264_s1 + $0x1a0] sm:$0xff] }
 0x17c   :  { %1595 = vmatpush3.bf16.msra.mxu1 %v2053_v26  ;;  %v1021_v26 = vld [vmem:[%s2264_s1 + $0xb0] sm:$0xff]  ;;  %v1651_v32 = vpack.c.bf16 %v1054_v12, %v1053_v5 }
 0x17d   :  { %1596 = vmatprep.subr.bf16.mxu1 %v1679_v21  ;;  %v1606_v28 = vpack.c.bf16 %v1022_v27, %v1021_v26  ;;  %1649 = vmatpush3.bf16.msra.mxu0 %v1648_v20  ;;  %v1060_v26 = vld [vmem:[%s2264_s1 + $0x1d8] sm:$0xff] }
 0x17e   :  { %1650 = vmatprep.subr.bf16.mxu0 %v1679_v21 }
 0x17f   :  { %1014 = vmatmul.mubr.msk.f32.vlgmr.msra.gmra.mrb[2].mxu1 %vm1962_vm11, %v1678_v30  ;;  %v1018_v30 = vld [vmem:[%s2264_s1 + $0x98] sm:$0xff] }
 0x180   :  { %1598 = vmatpush3.bf16.msra.mxu1 %v1597_v3  ;;  %v1600_v48 = vpack.c.bf16 %v1018_v30, %v1017_v19  ;;  %1427 = vmatprep.mubr.msk.f32.mxu1 %vm1680_vm12, %v1681_v44  ;;  %v1055_v19 = vld [vmem:[%s2264_s1 + $0x1b0] sm:$0xff]  ;;  %v1056_v3 = vld [vmem:[%s2264_s1 + $0x1b8] sm:$0xff] }
 0x181   :  { %1599 = vmatprep.subr.bf16.mxu1 %v1679_v21  ;;  %1652 = vmatpush3.bf16.msra.mxu0 %v1651_v32  ;;  %v1654_v30 = vpack.c.bf16 %v1056_v3, %v1055_v19 }
 0x182   :  { %1653 = vmatprep.subr.bf16.mxu0 %v1679_v21 }
 0x184   :  { %1601 = vmatpush3.bf16.msra.mxu1 %v1600_v48  ;;  %v1057_v48 = vld [vmem:[%s2264_s1 + $0x1c0] sm:$0xff] }
 0x185   :  { %1602 = vmatprep.subr.bf16.mxu1 %v1679_v21  ;;  %1655 = vmatpush3.bf16.msra.mxu0 %v1654_v30  ;;  %v1657_v23 = vpack.c.bf16 %v1058_v22, %v1057_v48 }
 0x186   :  { %1656 = vmatprep.subr.bf16.mxu0 %v1679_v21 }
 0x188   :  { %1604 = vmatpush3.bf16.msra.mxu1 %v1603_v25  ;;  %v1059_v25 = vld [vmem:[%s2264_s1 + $0x1d0] sm:$0xff] }
 0x189   :  { %1605 = vmatprep.subr.bf16.mxu1 %v1679_v21  ;;  %1658 = vmatpush3.bf16.msra.mxu0 %v1657_v23  ;;  %v1660_v27 = vpack.c.bf16 %v1060_v26, %v1059_v25 }
 0x18a   :  { %1659 = vmatprep.subr.bf16.mxu0 %v1679_v21 }
 0x18c   :  { %1607 = vmatpush3.bf16.msra.mxu1 %v1606_v28  ;;  %v1061_v28 = vld [vmem:[%s2264_s1 + $0x1e0] sm:$0xff] }
 0x18d   :  { %1608 = vmatprep.subr.bf16.mxu1 %v1679_v21  ;;  %1661 = vmatpush3.bf16.msra.mxu0 %v1660_v27  ;;  %v1663_v29 = vpack.c.bf16 %v1062_v10, %v1061_v28 }
 0x18e   :  { %1662 = vmatprep.subr.bf16.mxu0 %v1679_v21 }
 0x190   :  { %1610 = vmatpush3.bf16.msra.mxu1 %v1609_v33  ;;  %v1031_v33 = vld [vmem:[%s2266_s2 + $0x1] ss:$0 sm:$0xff] }
 0x191   :  { %1611 = vmatprep.subr.bf16.mxu1 %v1679_v21  ;;  %1664 = vmatpush3.bf16.msra.mxu0 %v1663_v29 }
 0x192   :  { %1665 = vmatprep.subr.bf16.mxu0 %v1679_v21 }
 0x194   :  { %1613 = vmatpush3.bf16.msra.mxu1 %v1612_v37 }
 0x195   :  { %1614 = vmatprep.subr.bf16.mxu1 %v1679_v21 }
 0x198   :  { %1616 = vmatpush3.bf16.msra.mxu1 %v1615_v39 }
 0x199   :  { %1617 = vmatprep.subr.bf16.mxu1 %v1679_v21 }
 0x19c   :  { %1619 = vmatpush3.bf16.msra.mxu1 %v1618_v43  ;;  %v1063_v43 = vld [vmem:[%s2264_s1 + $0x1f0] sm:$0xff] }
 0x19d   :  { %1620 = vmatprep.subr.bf16.mxu1 %v1679_v21 }
 0x212   :  { %v1178_v24 = vpop.f32.mrb[0].mxu1 }
 0x213   :  { %v1179_v47 = vpop.f32.mrb[1].mxu1 }
 0x214   :  { %v1180_v34 = vadd.f32 %v1179_v47, %v1178_v24  ;;  %v1048_v24 = vld [vmem:[%s2266_s2 + $0x2] ss:$0 sm:$0xff] }
 0x252   :  { %v1213_v50 = vpop.f32.mrb[2].mxu1 }
 0x253   :  { %v1214_v54 = vpop.f32.mrb[3].mxu1 }
 0x254   :  { %v1215_v55 = vadd.f32 %v1214_v54, %v1213_v50 }
 0x256   :  { %v710_v57 = vadd.f32 %v1215_v55, %v1180_v34 }
 0x258   :  { %1428 = vmatmul.mubr.f32.vlgmr.msra.gmra.mrb[4].mxu1 %v710_v57  ;;  %v1065_v57 = vld [vmem:[%s2266_s2 + $0x3] ss:$0 sm:$0xff] }
 0x259   :  { %1622 = vmatpush3.bf16.msra.mxu1 %v1621_v31  ;;  %1462 = vmatprep.mubr.msk.f32.mxu1 %vm1680_vm12, %v1681_v44 }
 0x25a   :  { %1623 = vmatprep.subr.bf16.mxu1 %v1679_v21 }
 0x25d   :  { %1625 = vmatpush3.bf16.msra.mxu1 %v1624_v59 }
 0x25e   :  { %1626 = vmatprep.subr.bf16.mxu1 %v1679_v21 }
 0x261   :  { %1628 = vmatpush3.bf16.msra.mxu1 %v1627_v63 }
 0x262   :  { %1629 = vmatprep.subr.bf16.mxu1 %v1679_v21 }
 0x265   :  { %1631 = vmatpush3.bf16.msra.mxu1 %v1630_v45 }
 0x266   :  { %1632 = vmatprep.subr.bf16.mxu1 %v1679_v21 }
 0x269   :  { %1634 = vmatpush3.bf16.msra.mxu1 %v1633_v4 }
 0x26a   :  { %1635 = vmatprep.subr.bf16.mxu1 %v1679_v21 }
 0x26d   :  { %1637 = vmatpush3.bf16.msra.mxu1 %v1636_v56 }
 0x26e   :  { %1638 = vmatprep.subr.bf16.mxu1 %v1679_v21 }
 0x271   :  { %1640 = vmatpush3.bf16.msra.mxu1 %v1639_v9 }
 0x272   :  { %1641 = vmatprep.subr.bf16.mxu1 %v1679_v21  ;;  %v1064_v21 = vld [vmem:[%s2264_s1 + $0x1f8] sm:$0xff] }
 0x273   :  { %v1666_v44 = vpack.c.bf16 %v1064_v21, %v1063_v43 }
 0x275   :  { %1643 = vmatpush3.bf16.msra.mxu1 %v1642_v14  ;;  %1667 = vmatpush3.bf16.msra.mxu0 %v1666_v44 }
 0x32b   :  { %v801_v35 = vpop.f32.mrb[4].mxu1 }
 0x32c   :  { %v802_v36 = vadd.f32 %v1031_v33, %v801_v35  ;;  %v1429_v37 = vpop.f32.mrb[5].mxu1 }
 0x32e   :  { %v806_v38 = vmul.f32 0.70710677, %v802_v36  ;;  %v805_v39 = vmul.f32 0.5, %v802_v36 }
 0x330   :  { %1672 = verf.f32 %v806_v38 }
 0x33a   :  { %v1673_v17 = vpop.eup %1672 }
 0x33b   :  { %v808_v41 = vadd.f32 1.0, %v1673_v17 }
 0x33d   :  { %v809_v42 = vmul.f32 %v808_v41, %v805_v39 }
 0x33f   :  { %1463 = vmatmul.mubr.f32.vlgmr.msra.gmra.mrb[6].mxu1 %v809_v42 }
 0x412   :  { %v898_v47 = vpop.f32.mrb[6].mxu1 }
 0x413   :  { %v899_v34 = vadd.f32 %v1048_v24, %v898_v47  ;;  %v1464_v50 = vpop.f32.mrb[7].mxu1 }
 0x415   :  { %v903_v51 = vmul.f32 0.70710677, %v899_v34  ;;  %v902_v54 = vmul.f32 0.5, %v899_v34 }
 0x417   :  { %1674 = verf.f32 %v903_v51 }
 0x421   :  { %v1675_v52 = vpop.eup %1674 }
 0x422   :  { %v905_v55 = vadd.f32 1.0, %v1675_v52 }
 0x424   :  { %v906_v31 = vmul.f32 %v905_v55, %v902_v54 }
 0x426   :  { %1498 = vmatmul.mubr.f32.vlgmr.msra.gmra.mrb[64].mxu0 %v906_v31 }
 0x4f9   :  { %v995_v40 = vpop.f32.mrb[64].mxu0 }
 0x4fa   :  { %v996_v58 = vadd.f32 %v1065_v57, %v995_v40  ;;  %v1499_v59 = vpop.f32.mrb[65].mxu0 }
 0x4fc   :  { %v999_v46 = vmul.f32 %v996_v58, %v996_v58 }
 0x4fe   :  { %1000 = vadd.xlane.f32.xlu0 %v999_v46 }
 0x58b   :  { %v1001_v61 = vpop.xlane.xlu0 %1000 }
 0x58c   :  { %v1002_v63 = vmax.f32 %v1001_v61, 1e-24 }
 0x58e   :  { %1676 = vrsqrt.f32 %v1002_v63 }
 0x598   :  { %v1677_v0 = vpop.eup %1676 }
 0x599   :  { %v1004_v49 = vmul.f32 %v1677_v0, %v996_v58 }
 0x59b   :  { %1005 = vst [vmem:[%s2267_s3] sm:$0xff] %v1004_v49 }

</bundles_post_ra>
